<compile_context>
chip_gen: v6e
topology: v6e:2x2x1
jax: 0.10.0
libtpu: 0.0.40
codegen_flags: <defaults>
</compile_context>

<pallas_src>
import jax
import jax.numpy as jnp
from jax.experimental import pallas as pl
from jax.experimental.pallas import tpu as pltpu


def qa_head_kernel(x_ref, w1t_ref, gsum_ref, b1_ref, w2p_ref, b2p_ref,
                   out_ref, acc_ref):
    # x_ref:    (TR, TS)  f32   row tile of x2d (rows = sample*channel)
    # w1t_ref:  (TR, 64)  f32   w1[c,:]/S replicated per sample row
    # gsum_ref: (NB, TR)  f32   group-sum matrix (1.0 where row belongs to sample)
    # b1_ref:   (1, 64)   f32
    # w2p_ref:  (64, 128) f32   w2 padded to 128 output lanes
    # b2p_ref:  (1, 128)  f32
    # out_ref:  (NB, 128) f32   lane-dense padded output tile
    # acc_ref:  (TR, 1)   f32   running spatial sum
    s = pl.program_id(1)
    num_s = pl.num_programs(1)

    @pl.when(s == 0)
    def _init():
        acc_ref[...] = jnp.zeros_like(acc_ref)

    # Partial spatial sum for this S tile (VPU/XLU reduction; MXU stays out of
    # the mem-bound streaming phase).
    acc_ref[...] += jnp.sum(x_ref[...], axis=-1, keepdims=True)      # (TR, 1)

    @pl.when(s == num_s - 1)
    def _epilogue():
        # acc holds sum_s x[r, s]; w1t rows already carry w1[c,:]/S, so this
        # broadcast-multiply is mean(x) * w1 without a skinny MXU matmul.
        t = acc_ref[...] * w1t_ref[...]                              # (TR, 64) VPU
        # Group-sum over the C channel rows of each sample + bias (tiny, runs once).
        h = jnp.dot(gsum_ref[...], t,
                    preferred_element_type=jnp.float32) + b1_ref[...]   # (NB, 64)
        h = jnp.maximum(h, 0.0)                                      # ReLU
        # Second Linear into a lane-dense (NB, 128) slab (cols >= 3 have zero weights).
        out = jnp.dot(h, w2p_ref[...],
                      preferred_element_type=jnp.float32) + b2p_ref[...]  # (NB, 128)
        out_ref[...] = out.astype(out_ref.dtype)


def qa_head_forward(x_ncdhw, w1, b1, w2, b2, *, tile_s=None):
    """x_ncdhw: (N, C, D, H, W) float32 -> (N, 3) float32."""
    N, C, D, H, W = x_ncdhw.shape
    S = D * H * W
    R = N * C
    OUT_PAD = 128  # lane-dense output width

    # ---- row tiling (samples per output tile) ----
    if R <= 512:
        NB = N                      # single row tile; blocks equal the full dims
    else:
        NB = 64                     # multiple of 8 -> clean sublane tiling for big N
    N_pad = pl.cdiv(N, NB) * NB
    TR = NB * C
    R_pad = N_pad * C

    # ---- spatial (S) tiling: largest lane-aligned tile within a small VMEM budget
    #      (double-buffered x tile stays well under v7x's 64 MiB VMEM) ----
    if tile_s is None:
        budget = 4 * 1024 * 1024                       # bytes per x tile buffer
        tile_s = max(128, min(((budget // (4 * TR)) // 128) * 128, 16384))
    TS = min(int(tile_s), ((S + 127) // 128) * 128)
    TS = max(128, (TS // 128) * 128)
    S_pad = pl.cdiv(S, TS) * TS
    num_s = S_pad // TS
    num_r = N_pad // NB

    # ---- wrapper-side layout / parameter packing (tiny, off the hot path) ----
    x2d = x_ncdhw.reshape(R, S)                        # contiguous view, no copy
    if R_pad != R or S_pad != S:
        x2d = jnp.pad(x2d, ((0, R_pad - R), (0, S_pad - S)))  # zeros don't change the sum

    inv_s = 1.0 / float(S)
    w1t = jnp.tile(w1.astype(jnp.float32) * inv_s, (NB, 1))            # (TR, 64)
    gsum = jnp.repeat(jnp.eye(NB, dtype=jnp.float32), C, axis=1)       # (NB, TR)
    b1_2d = b1.reshape(1, -1).astype(jnp.float32)                      # (1, 64)
    w2p = jnp.zeros((w2.shape[0], OUT_PAD), jnp.float32).at[:, :w2.shape[1]].set(w2)
    b2p = jnp.zeros((1, OUT_PAD), jnp.float32).at[0, :b2.shape[0]].set(b2)

    out_padded = pl.pallas_call(
        qa_head_kernel,
        out_shape=jax.ShapeDtypeStruct((N_pad, OUT_PAD), jnp.float32),
        grid_spec=pltpu.PrefetchScalarGridSpec(
            num_scalar_prefetch=0,
            grid=(num_r, num_s),
            in_specs=[
                pl.BlockSpec((TR, TS), lambda r, s: (r, s)),        # x2d (streamed)
                pl.BlockSpec((TR, 64), lambda r, s: (0, 0)),        # w1t (resident)
                pl.BlockSpec((NB, TR), lambda r, s: (0, 0)),        # gsum
                pl.BlockSpec((1, 64), lambda r, s: (0, 0)),         # b1
                pl.BlockSpec((64, OUT_PAD), lambda r, s: (0, 0)),   # w2 (padded)
                pl.BlockSpec((1, OUT_PAD), lambda r, s: (0, 0)),    # b2 (padded)
            ],
            out_specs=pl.BlockSpec((NB, OUT_PAD), lambda r, s: (r, 0)),
            scratch_shapes=[pltpu.VMEM((TR, 1), jnp.float32)],
        ),
        compiler_params=pltpu.CompilerParams(
            dimension_semantics=("parallel", "arbitrary")),
    )(x2d, w1t, gsum, b1_2d, w2p, b2p)

    return out_padded[:N, :3]


def reference_forward(x_ncdhw, w1, b1, w2, b2):
    # Pure-JAX reference (matches PyTorch semantics).
    pooled = jnp.mean(x_ncdhw, axis=(2, 3, 4))         # (N, C)
    h = jnp.maximum(pooled @ w1 + b1, 0.0)
    return h @ w2 + b2


if __name__ == "__main__":
    key = jax.random.PRNGKey(0)
    k_x, k_w1, k_b1, k_w2, k_b2 = jax.random.split(key, 5)

    # Small shapes consistent with the module: input_channels=4, 3D volume 8^3.
    N, C, D, H, W = 2, 4, 8, 8, 8
    x = jax.random.normal(k_x, (N, C, D, H, W), dtype=jnp.float32)

    # Linear(C,64) and Linear(64,3) parameters.
    w1 = jax.random.normal(k_w1, (C, 64), dtype=jnp.float32) * (1.0 / jnp.sqrt(C))
    b1 = jax.random.normal(k_b1, (64,), dtype=jnp.float32) * 0.01
    w2 = jax.random.normal(k_w2, (64, 3), dtype=jnp.float32) * (1.0 / jnp.sqrt(64.0))
    b2 = jax.random.normal(k_b2, (3,), dtype=jnp.float32) * 0.01

    # tile_s=128 -> 4 S-steps at this toy size, exercising the pipelined
    # accumulator path (default auto-tiling picks the full 512 lanes here).
    out = qa_head_forward(x, w1, b1, w2, b2, tile_s=128)
    out = jax.block_until_ready(out)

    ref = reference_forward(x, w1, b1, w2, b2)
    assert out.shape == (N, 3)
    assert jnp.allclose(out, ref, atol=1e-4, rtol=1e-4), (out, ref)

    print("KERNEL_OK")
</pallas_src>

<mosaic_0001>
module attributes {stable_mosaic.version = 11 : i64} {
  func.func @qa_head_kernel(%arg0: i32, %arg1: i32, %arg2: memref<8x128xf32, #tpu.memory_space<vmem>>, %arg3: memref<8x64xf32, #tpu.memory_space<vmem>>, %arg4: memref<2x8xf32, #tpu.memory_space<vmem>>, %arg5: memref<1x64xf32, #tpu.memory_space<vmem>>, %arg6: memref<64x128xf32, #tpu.memory_space<vmem>>, %arg7: memref<1x128xf32, #tpu.memory_space<vmem>>, %arg8: memref<2x128xf32, #tpu.memory_space<vmem>>, %arg9: memref<8x1xf32, #tpu.memory_space<vmem>>) attributes {dimension_semantics = [#tpu.dimension_semantics<parallel>, #tpu.dimension_semantics<arbitrary>], iteration_bounds = array<i64: 1, 4>, scalar_prefetch = 0 : i64, scratch_operands = 1 : i64, tpu.core_type = #tpu.core_type<tc>, window_params = [{transform_indices = @transform_0, window_bounds = array<i64: 8, 128>}, {pipeline_mode = #tpu.pipeline_mode<synchronous>, transform_indices = @transform_1, window_bounds = array<i64: 8, 64>}, {pipeline_mode = #tpu.pipeline_mode<synchronous>, transform_indices = @transform_2, window_bounds = array<i64: 2, 8>}, {pipeline_mode = #tpu.pipeline_mode<synchronous>, transform_indices = @transform_3, window_bounds = array<i64: 1, 64>}, {pipeline_mode = #tpu.pipeline_mode<synchronous>, transform_indices = @transform_4, window_bounds = array<i64: 64, 128>}, {pipeline_mode = #tpu.pipeline_mode<synchronous>, transform_indices = @transform_5, window_bounds = array<i64: 1, 128>}, {transform_indices = @transform_6, window_bounds = array<i64: 2, 128>}]} {
    %c0_i32 = arith.constant 0 : i32
    %0 = arith.cmpi eq, %arg1, %c0_i32 : i32
    %1 = arith.extui %0 : i1 to i32
    %c0_i32_0 = arith.constant 0 : i32
    %2 = arith.cmpi ne, %1, %c0_i32_0 : i32
    scf.if %2 {
      %cst_7 = arith.constant 0.000000e+00 : f32
      %12 = vector.broadcast %cst_7 : f32 to vector<8x1xf32>
      %c0_8 = arith.constant 0 : index
      %c0_9 = arith.constant 0 : index
      %13 = vector.load %arg9[%c0_8, %c0_9] : memref<8x1xf32, #tpu.memory_space<vmem>>, vector<8x1xf32>
      tpu.vector_store %arg9[%c0_8, %c0_9], %12 {strides = array<i32>} : memref<8x1xf32, #tpu.memory_space<vmem>>, vector<8x1xf32>,
    } else {
    }
    %c0 = arith.constant 0 : index
    %c0_1 = arith.constant 0 : index
    %3 = vector.load %arg9[%c0, %c0_1] : memref<8x1xf32, #tpu.memory_space<vmem>>, vector<8x1xf32>
    %c0_2 = arith.constant 0 : index
    %c0_3 = arith.constant 0 : index
    %4 = vector.load %arg2[%c0_2, %c0_3] : memref<8x128xf32, #tpu.memory_space<vmem>>, vector<8x128xf32>
    %cst = arith.constant dense<0.000000e+00> : vector<8xf32>
    %5 = vector.multi_reduction <add>, %4, %cst [1] : vector<8x128xf32> to vector<8xf32>
    %6 = vector.shape_cast %5 : vector<8xf32> to vector<8x1xf32>
    %7 = arith.addf %3, %6 : vector<8x1xf32>
    %c0_4 = arith.constant 0 : index
    %c0_5 = arith.constant 0 : index
    %8 = vector.load %arg9[%c0_4, %c0_5] : memref<8x1xf32, #tpu.memory_space<vmem>>, vector<8x1xf32>
    tpu.vector_store %arg9[%c0_4, %c0_5], %7 {strides = array<i32>} : memref<8x1xf32, #tpu.memory_space<vmem>>, vector<8x1xf32>,
    %c3_i32 = arith.constant 3 : i32
    %9 = arith.cmpi eq, %arg1, %c3_i32 : i32
    %10 = arith.extui %9 : i1 to i32
    %c0_i32_6 = arith.constant 0 : i32
    %11 = arith.cmpi ne, %10, %c0_i32_6 : i32
    scf.if %11 {
      %c0_7 = arith.constant 0 : index
      %c0_8 = arith.constant 0 : index
      %12 = vector.load %arg9[%c0_7, %c0_8] : memref<8x1xf32, #tpu.memory_space<vmem>>, vector<8x1xf32>
      %c0_9 = arith.constant 0 : index
      %c0_10 = arith.constant 0 : index
      %13 = vector.load %arg3[%c0_9, %c0_10] : memref<8x64xf32, #tpu.memory_space<vmem>>, vector<8x64xf32>
      %14 = vector.broadcast %12 : vector<8x1xf32> to vector<8x64xf32>
      %15 = arith.mulf %14, %13 : vector<8x64xf32>
      %c0_11 = arith.constant 0 : index
      %c0_12 = arith.constant 0 : index
      %16 = vector.load %arg4[%c0_11, %c0_12] : memref<2x8xf32, #tpu.memory_space<vmem>>, vector<2x8xf32>
      %cst_13 = arith.constant dense<0.000000e+00> : vector<2x64xf32>
      %17 = tpu.matmul %16, %15, %cst_13 {dimension_numbers = #tpu.dot_dimension_numbers<[1], [0], [0], [1], [0, 0, 1, 1], [], []>} : vector<2x8xf32>, vector<8x64xf32>, vector<2x64xf32> -> vector<2x64xf32>
      %c0_14 = arith.constant 0 : index
      %c0_15 = arith.constant 0 : index
      %18 = vector.load %arg5[%c0_14, %c0_15] : memref<1x64xf32, #tpu.memory_space<vmem>>, vector<1x64xf32>
      %19 = vector.broadcast %18 : vector<1x64xf32> to vector<2x64xf32>
      %20 = arith.addf %17, %19 : vector<2x64xf32>
      %cst_16 = arith.constant 0.000000e+00 : f32
      %21 = vector.broadcast %cst_16 : f32 to vector<2x64xf32>
      %22 = arith.maximumf %20, %21 : vector<2x64xf32>
      %c0_17 = arith.constant 0 : index
      %c0_18 = arith.constant 0 : index
      %23 = vector.load %arg6[%c0_17, %c0_18] : memref<64x128xf32, #tpu.memory_space<vmem>>, vector<64x128xf32>
      %cst_19 = arith.constant dense<0.000000e+00> : vector<2x128xf32>
      %24 = tpu.matmul %22, %23, %cst_19 {dimension_numbers = #tpu.dot_dimension_numbers<[1], [0], [0], [1], [0, 0, 1, 1], [], []>} : vector<2x64xf32>, vector<64x128xf32>, vector<2x128xf32> -> vector<2x128xf32>
      %c0_20 = arith.constant 0 : index
      %c0_21 = arith.constant 0 : index
      %25 = vector.load %arg7[%c0_20, %c0_21] : memref<1x128xf32, #tpu.memory_space<vmem>>, vector<1x128xf32>
      %26 = vector.broadcast %25 : vector<1x128xf32> to vector<2x128xf32>
      %27 = arith.addf %24, %26 : vector<2x128xf32>
      %c0_22 = arith.constant 0 : index
      %c0_23 = arith.constant 0 : index
      %28 = vector.load %arg8[%c0_22, %c0_23] : memref<2x128xf32, #tpu.memory_space<vmem>>, vector<2x128xf32>
      tpu.vector_store %arg8[%c0_22, %c0_23], %27 {strides = array<i32>} : memref<2x128xf32, #tpu.memory_space<vmem>>, vector<2x128xf32>,
    } else {
    }
    return
  }
  func.func @transform_0(%arg0: i32, %arg1: i32) -> (i32, i32) {
    %c0_i32 = arith.constant 0 : i32
    return %arg0, %arg1 : i32, i32
  }
  func.func @transform_1(%arg0: i32, %arg1: i32) -> (i32, i32) {
    %c0_i32 = arith.constant 0 : i32
    %c0_i32_0 = arith.constant 0 : i32
    %c0_i32_1 = arith.constant 0 : i32
    return %c0_i32, %c0_i32_0 : i32, i32
  }
  func.func @transform_2(%arg0: i32, %arg1: i32) -> (i32, i32) {
    %c0_i32 = arith.constant 0 : i32
    %c0_i32_0 = arith.constant 0 : i32
    %c0_i32_1 = arith.constant 0 : i32
    return %c0_i32, %c0_i32_0 : i32, i32
  }
  func.func @transform_3(%arg0: i32, %arg1: i32) -> (i32, i32) {
    %c0_i32 = arith.constant 0 : i32
    %c0_i32_0 = arith.constant 0 : i32
    %c0_i32_1 = arith.constant 0 : i32
    return %c0_i32, %c0_i32_0 : i32, i32
  }
  func.func @transform_4(%arg0: i32, %arg1: i32) -> (i32, i32) {
    %c0_i32 = arith.constant 0 : i32
    %c0_i32_0 = arith.constant 0 : i32
    %c0_i32_1 = arith.constant 0 : i32
    return %c0_i32, %c0_i32_0 : i32, i32
  }
  func.func @transform_5(%arg0: i32, %arg1: i32) -> (i32, i32) {
    %c0_i32 = arith.constant 0 : i32
    %c0_i32_0 = arith.constant 0 : i32
    %c0_i32_1 = arith.constant 0 : i32
    return %c0_i32, %c0_i32_0 : i32, i32
  }
  func.func @transform_6(%arg0: i32, %arg1: i32) -> (i32, i32) {
    %c0_i32 = arith.constant 0 : i32
    %c0_i32_0 = arith.constant 0 : i32
    return %arg0, %c0_i32 : i32, i32
  }
}

</mosaic_0001>

<bundles_post_ra>
// kernel: tpu_custom_call.1
= control target key start
LH: loop header
LB: loop body
LE: loop exit
PB: predicated region body
PF: predicated region fallthrough
CT: control target
= control target key end

     0   :  { %11 = vsyncpa [#allocation4], 0  ;;  %s1106_s0 = inlined_call_operand.hbm [shape: f32[8,512], index: 0, kind: input, shape index: {}]   ;;  %s1107_s1 = inlined_call_operand.hbm [shape: f32[8,64], index: 1, kind: input, shape index: {}]   ;;  %s1108_s2 = inlined_call_operand.vmem [shape: f32[2,8], index: 2, kind: input, shape index: {}]   ;;  %s1109_s3 = inlined_call_operand.vmem [shape: f32[1,64], index: 3, kind: input, shape index: {}]   ;;  %s1110_s4 = inlined_call_operand.hbm [shape: f32[64,128], index: 4, kind: input, shape index: {}]   ;;  %s1111_s5 = inlined_call_operand.vmem [shape: f32[1,128], index: 5, kind: input, shape index: {}]   ;;  %s1112_s6 = inlined_call_operand.hbm [shape: f32[2,128], index: 6, kind: output, shape index: {}]  }
   0x1   :  { %13 = vsyncpa [#allocation4 + $0x1], 0 }
   0x2   :  { %14 = vsyncpa [#allocation7], 0 }
   0x3   :  { %15 = vsyncpa [#allocation5], 0  ;;  %s947_s21 = smov 0   ;;  %s949_s22 = smov 0  }
   0x4   :  { %s951_s23 = smov 0   ;;  %s953_s24 = smov 0  }
   0x5   :  { %s955_s25 = smov 0   ;;  %s957_s26 = smov 0  }
   0x6 LB: > { %s592_s27 = sadd.s32 4294967295, %s900_s26   ;;  %p55_p0 = scmp.ne.s32.totalorder %s884_s22, %s880_s21  ;;  %s900_s26 = sphi %s957_s26, %s21_s26   ;;  %s896_s25 = sphi %s955_s25, %s1130_s25   ;;  %s892_s24 = sphi %s953_s24, %s1129_s24   ;;  %s888_s23 = sphi %s951_s23, %s1128_s23   ;;  %s884_s22 = sphi %s949_s22, %s1127_s22   ;;  %s880_s21 = sphi %s947_s21, %s1126_s21  }
   0x7   : > { %p979_p1 = scmp.eq.s32.totalorder %s592_s27, 0  ;;  %p593_p2 = scmp.ge.s32.totalorder %s900_s26, 1 }
   0x8   : > { %p197_p3 = scmp.lt.s32.totalorder %s900_s26, 5  ;;  %s902_s7 = smov [#allocation6]  }
   0x9   : > { %s1117_s28 = scalar_select %p979_p1, 1, 0 }
   0xa   : > { %p987_p4 = por %p979_p1, %p55_p0  ;;  %p991_p5 = pnand %p593_p2, %p197_p3 }
   0xb   : > { %s210_s8 = sshll.u32 %s902_s7, 4  ;;  %s903_s9 = smov [#allocation8]   ;;  %s211_s8 = int_to_ptr.vmem [resolvable:$true] %s210_s8 }
   0xc   : > { %s1118_s29 = scalar_select %p987_p4, 1, 0 }
   0xd   : > { %s1119_s30 = scalar_select %p991_p5, 1, 0 }
   0xe   : > { %p662_p6 = pneg %p991_p5  ;;  %s226_s10 = sshll.u32 %s903_s9, 4  ;;  %s227_s10 = int_to_ptr.vmem [resolvable:$true] %s226_s10 }
   0xf   : > { %s749_s12 = scalar_lea.vmem %s211_s8, 128  ;;  %p757_p12 = scmp.lt.s32.totalorder %s211_s8, %s211_s8 }
  0x10   : > { %p999_p7 = pnand %p662_p6, %p979_p1  ;;  %p750_p9 = scmp.ne.s32.totalorder %s211_s8, %s749_s12 }
  0x11   : > { %p758_p13 = scmp.lt.s32.totalorder %s749_s12, %s749_s12 }
  0x12   : > { %p740_p8 = pneg %p999_p7 }
  0x13   : > { %p759_p0 = por %p758_p13, %p757_p12 }
  0x14   : > { %p752_p10 = pnand %p750_p9, %p740_p8 }
  0x16   : > { %p753_p11 = pneg %p752_p10 }
  0x18   : > { %p760_p2 = pnand %p759_p0, %p753_p11 }
  0x1a   : > { %763 = shalt.err (!%p760_p2)
}
  0x1b   : > { %665 = dma.hbm_to_vmem [thread:$0]  (!%p999_p7), %s1107_s1, 128, %s211_s8, [#allocation7]  }
  0x1c   : > { %s775_s15 = scalar_lea.vmem %s227_s10, 1024  ;;  %p783_p9 = scmp.lt.s32.totalorder %s227_s10, %s227_s10 }
  0x1d   : > { %p776_p3 = scmp.ne.s32.totalorder %s227_s10, %s775_s15  ;;  %p784_p10 = scmp.lt.s32.totalorder %s775_s15, %s775_s15 }
  0x1f   : > { %p778_p6 = pnand %p776_p3, %p740_p8  ;;  %p785_p4 = por %p784_p10, %p783_p9 }
  0x21   : > { %p779_p1 = pneg %p778_p6 }
  0x23   : > { %p786_p5 = pnand %p785_p4, %p779_p1 }
  0x25   : > { %789 = shalt.err (!%p786_p5)
}
  0x26   : > { %s904_s16 = smov 128   ;;  %s905_s17 = smov 8  }
  0x27   : > { %668 = dma.hbm_to_vmem [thread:$0]  (!%p999_p7), %s1110_s4, 1024, %s227_s10, [#allocation7], %s904_s16, %s904_s16, %s905_s17  }
  0x28   : > { %s30_s20 = sadd.s32 1, %s896_s25  ;;  %s42_s21 = sadd.s32 1, %s888_s23 }
  0x29   : > { %p31_p1 = scmp.ge.s32.totalorder %s30_s20, 4  ;;  %p49_p4 = scmp.ne.s32.totalorder %s888_s23, %s884_s22 }
  0x2a   : > { %p50_p5 = scmp.eq.s32.totalorder %s900_s26, 0  ;;  %p675_p8 = scmp.lt.s32.totalorder %s900_s26, 4 }
  0x2b   : > { %s1132_s20 = smov (%p31_p1, %s30_s20), 0  ;;  %s243_s7 = sand.u32 1, %s888_s23  }
  0x2c   : > { %p51_p11 = por %p50_p5, %p49_p4  ;;  %s38_s8 = ssub.s32 %s896_s25, %s1132_s20 }
  0x2d   : > { %p40_p12 = scmp.eq.s32.totalorder %s38_s8, 0  ;;  %s597_s9 = sshll.u32 %s243_s7, 3 }
  0x2e   : > { %s598_s11 = sshll.u32 %s896_s25, 7  ;;  %s247_s15 = scalar_lea.vmem [#allocation3], %s597_s9 }
  0x2f   : > { %s1034_s12 = scalar_select %p40_p12, %s888_s23, %s42_s21  }
  0x30   : > { %s254_s14 = scalar_lea.hbm %s1106_s0, %s598_s11  ;;  %s256_s16 = sshll.u32 %s247_s15, 4  ;;  %s257_s16 = int_to_ptr.vmem [resolvable:$true] %s256_s16 }
  0x31   : > { %p1041_p7 = pnand %p675_p8, %p51_p11  ;;  %s244_s18 = scalar_lea.sflag [#allocation4], %s243_s7 }
  0x32   : > { %s803_s19 = scalar_lea.vmem %s257_s16, 128  ;;  %s906_s21 = smov [#allocation3]  }
  0x33   : > { %p792_p13 = pneg %p1041_p7  ;;  %p804_p0 = scmp.ne.s32.totalorder %s257_s16, %s803_s19 }
  0x34   : > { %s808_s8 = sshll.u32 %s906_s21, 4  ;;  %s809_s8 = int_to_ptr.vmem [resolvable:$false] %s808_s8 }
  0x35   : > { %p806_p2 = pnand %p804_p0, %p792_p13  ;;  %s810_s11 = scalar_lea.vmem %s809_s8, 256 }
  0x36   : > { %p811_p6 = scmp.lt.s32.totalorder %s257_s16, %s809_s8  ;;  %p812_p9 = scmp.lt.s32.totalorder %s810_s11, %s803_s19 }
  0x37   : > { %p807_p3 = pneg %p806_p2 }
  0x38   : > { %p813_p10 = por %p812_p9, %p811_p6 }
  0x3a   : > { %p814_p1 = pnand %p813_p10, %p807_p3 }
  0x3c   : > { %817 = shalt.err (!%p814_p1)
}
  0x3d   : > { %672 = dma.hbm_to_vmem [thread:$0]  (!%p1041_p7), %s254_s14, 128, %s257_s16, %s244_s18  }
  0x3e   : > { %p1122_p4 = scmp.ne.s32.totalorder %s1119_s30, 0 }
  0x3f   : > { %s267_s7 = sand.u32 (!%p1122_p4), 1, %s884_s22   ;;  %p1123_p5 = scmp.ne.s32.totalorder (!%p1122_p4), %s1118_s29, 0 }
  0x40   : > { %265 = sbr.rel (%p1122_p4) target bundleno = 766 (0x2fe), region = 44  ;;  %s600_s9 = sshll.u32 (!%p1122_p4), %s267_s7, 3 }
  0x41   : > { %s268_s13 = scalar_lea.sflag (!%p1122_p4), [#allocation4], %s267_s7  ;;  %s271_s10 = scalar_lea.vmem (!%p1122_p4), [#allocation3], %s600_s9 }
  0x45   : > { %867 = dma.done.wait (%p1123_p5), %s268_s13, 128  }
  0x46   : > { %869 = vsyncadd (%p1123_p5), %s268_s13, 4294967168  ;;  %p1124_p8 = scmp.ne.s32.totalorder %s1117_s28, 0 }
  0x48   : > { %871 = dma.done.wait (%p1124_p8), [#allocation7], 1152  }
  0x49   : > { %873 = vsyncadd (%p1124_p8), [#allocation7], 4294966144  ;;  %p603_p11 = scmp.ne.s32.totalorder %s892_s24, 0 }
  0x4b   : > { %306 = sbr.rel (%p603_p11) target bundleno = 82 (0x52), region = 60 }
  0x50   : > { %vm307_vm0 = vcmask 7168   ;;  %v907_v0 = vmov 0.0  }
  0x51   : > { %308 = vst.msk [vmem:[#allocation2] sm:$0xff] %vm307_vm0, %v907_v0 }
  0x52 PF: > { %v310_v1 = vld [vmem:[%s271_s10] sm:$0xff]  ;;  %vm314_vm1 = vcmask 7168   ;;  %p604_p12 = scmp.ne.s32.totalorder %s892_s24, 3 }
  0x53   : > { %311 = vadd.xlane.f32.xlu0 %v310_v1 }
  0x58   : > { %v309_v2 = vld [vmem:[#allocation2] sm:$0xff] }
  0xdb   : > { %319 = sbr.rel (%p604_p12) target bundleno = 751 (0x2ef), region = 64 }
  0xdc   : > { %v312_v3 = vpop.xlane.xlu0 %311 }
  0xdd   : > { %v313_v4 = vadd.f32 %v312_v3, %v309_v2 }
  0xdf   : > { %315 = vst.msk [vmem:[#allocation2] sm:$0xff] %vm314_vm1, %v313_v4 }
  0xe0   : > { %v908_v6 = vmov 0   ;;  %v909_v7 = vmov 0.0   ;;  %v418_v8 = vld [vmem:[#allocation8 + $0x38] sm:$0xff]  ;;  %vm910_vm2 = vmmov 0   ;;  %v417_v9 = vld [vmem:[#allocation8 + $0x30] sm:$0xff]  ;;  %v416_v10 = vld [vmem:[#allocation8 + $0x28] sm:$0xff] }
  0xe1   : > { %737 = vset.pattern.permute.xlu0 %v908_v6  ;;  %624 = vmatprep.subr.mxu0 %v909_v7  ;;  %v415_v11 = vld [vmem:[#allocation8 + $0x20] sm:$0xff]  ;;  %v414_v12 = vld [vmem:[#allocation8 + $0x18] sm:$0xff]  ;;  %vm336_vm3 = vcmask 64512   ;;  %v413_v17 = vld [vmem:[#allocation8 + $0x10] sm:$0xff]  ;;  %vm426_vm4 = vcmask 523264  }
  0xe2   : > { %626 = vmatprep.mubr.msk.f32.mxu0 %vm910_vm2, %v909_v7  ;;  %629 = vmatprep.subr.mxu1 %v909_v7  ;;  %v321_v13 = vld [vmem:[#allocation6] sm:$0xff]  ;;  %v328_v16 = vld [vmem:[%s1108_s2] sm:$0x3]  ;;  %v412_v18 = vld [vmem:[#allocation8 + $0x8] sm:$0xff] }
  0xe3   : > { %645 = vmatprep.mubr.msk.f32.mxu1 %vm910_vm2, %v909_v7  ;;  %630 = vmatpush3.msra.mxu1 %v418_v8  ;;  %v411_v19 = vld [vmem:[#allocation8] sm:$0xff] }
  0xe4   : > { %631 = vmatprep.subr.mxu1 %v909_v7  ;;  %v605_v20 = vld [vmem:[%s1109_s3] ss:$0 sm:$0xff] }
  0xe5   : > { %632 = vmatpush3.msra.mxu1 %v417_v9  ;;  %v607_v25 = vld [vmem:[%s1111_s5] ss:$0 sm:$0xff] }
  0xe6   : > { %v320_v5 = vld [vmem:[#allocation2] sm:$0xff]  ;;  %633 = vmatprep.subr.mxu1 %v909_v7 }
  0xe7   : > { %324 = vperm.xlu0 %737, %v320_v5   ;;  %634 = vmatpush3.msra.mxu1 %v416_v10 }
  0xe8   : > { %635 = vmatprep.subr.mxu1 %v909_v7 }
  0xe9   : > { %636 = vmatpush3.msra.mxu1 %v415_v11 }
  0xea   : > { %637 = vmatprep.subr.mxu1 %v909_v7 }
  0xeb   : > { %638 = vmatpush3.msra.mxu1 %v414_v12 }
  0xec   : > { %639 = vmatprep.subr.mxu1 %v909_v7 }
  0xed   : > { %640 = vmatpush3.msra.mxu1 %v413_v17 }
  0xee   : > { %641 = vmatprep.subr.mxu1 %v909_v7 }
  0xef   : > { %642 = vmatpush3.msra.mxu1 %v412_v18 }
  0xf0   : > { %643 = vmatprep.subr.mxu1 %v909_v7 }
  0xf1   : > { %644 = vmatpush3.msra.mxu1 %v411_v19 }
 0x162   : > { %v325_v14 = vpop.permute.xlu0 %324 }
 0x163   : > { %v327_v15 = vmul.f32 %v325_v14, %v321_v13 }
 0x165   : > { %625 = vmatpush3.msra.mxu0 %v327_v15 }
 0x166   : > { %627 = vmatmul.mubr.msk.f32.vlgmr.msra.gmra.mxu0 %vm336_vm3, %v328_v16 }
 0x226   : > { %v406_v21 = vpop.f32.mrf.mxu0 }
 0x227   : > { %v407_v22 = vadd.f32 %v605_v20, %v406_v21 }
 0x228   : > { %v628_v23 = vpop.f32.mrf.mxu0 }
 0x229   : > { %v410_v24 = vmax.f32 %v407_v22, 0.0 }
 0x22b   : > { %646 = vmatmul.mubr.msk.f32.vlgmr.msra.gmra.mxu1 %vm426_vm4, %v410_v24 }
 0x2eb   : > { %v496_v26 = vpop.f32.mrf.mxu1 }
 0x2ec   : > { %v497_v27 = vadd.f32 %v607_v25, %v496_v26 }
 0x2ed   : > { %v647_v28 = vpop.f32.mrf.mxu1 }
 0x2ee   : > { %500 = vst [vmem:[#allocation9] sm:$0x3] %v497_v27 }
 0x2ef PF: > { %p1073_p7 = scmp.eq.s32.totalorder %s592_s27, 3  ;;  %s911_s17 = smov [#allocation9]  }
 0x2f0   : > { %s510_s18 = sshll.u32 %s911_s17, 4  ;;  %s511_s18 = int_to_ptr.vmem [resolvable:$true] %s510_s18 }
 0x2f1   : > { %s818_s19 = scalar_lea.vmem %s511_s18, 32  ;;  %p825_p3 = scmp.lt.s32.totalorder %s511_s18, %s511_s18 }
 0x2f2   : > { %p819_p13 = scmp.ne.s32.totalorder %s511_s18, %s818_s19  ;;  %p826_p6 = scmp.lt.s32.totalorder %s818_s19, %s818_s19 }
 0x2f4   : > { %p820_p0 = pnand %p819_p13, %p1073_p7  ;;  %p827_p9 = por %p826_p6, %p825_p3 }
 0x2f6   : > { %p821_p2 = pneg %p820_p0 }
 0x2f8   : > { %p828_p10 = pnand %p827_p9, %p821_p2 }
 0x2fa   : > { %831 = shalt.err (!%p828_p10)
}
 0x2fb   : > { %659 = dma.vmem_to_hbm [thread:$0]  (%p1073_p7), %s511_s18, 32, %s1112_s6, [#allocation5]  }
 0x2fc   : > { %875 = dma.done.wait (%p1073_p7), [#allocation5], 32  }
 0x2fd   : > { %877 = vsyncadd (%p1073_p7), [#allocation5], 4294967264 }
 0x2fe PF: > { %s21_s26 = sadd.s32 1, %s900_s26   ;;  %s1126_s21 = smov %s884_s22 }
 0x2ff   : > { %p18_p1 = scmp.ge.s32.totalorder %s21_s26, 6   ;;  %s1127_s22 = smov %s888_s23 }
 0x300   : > { %s1128_s23 = smov %s1034_s12  ;;  %s1129_s24 = smov %s896_s25 }
 0x301   : > { %s1130_s25 = smov %s1132_s20  ;;  %20 = sbr.rel (!%p18_p1) target bundleno = 6 (0x6), region = 98 }
 0x306   :  { %523 = vsyncpa [#allocation4], 1 }
 0x307   :  { %525 = vsyncpa [#allocation4 + $0x1], 1 }
 0x308   :  { %526 = vsyncpa [#allocation7], 1 }
 0x309   :  { %527 = vsyncpa [#allocation5], 1 }
 0x30a   :  { %529 = vsyncpa [#allocation5 + $0x1], 1 }

</bundles_post_ra>
